<compile_context>
chip_gen: v6e
topology: v6e:2x2x1
jax: 0.10.0
libtpu: 0.0.40
codegen_flags: <defaults>
</compile_context>

<pallas_src>
import jax
import jax.numpy as jnp
from jax.experimental import pallas as pl
from jax.experimental.pallas import tpu as pltpu


# ----------------------------------------------------------------------------
# Kernels
# ----------------------------------------------------------------------------
def ffn_resident_kernel(x_ref, w1_ref, b1_ref, w2_ref, b2_ref, gamma_ref, beta_ref,
                        o_ref):
    """Fast path: full W1/W2 resident in VMEM, no reduction axis."""
    x = x_ref[...]                                            # (TM, d_model) f32
    h = jnp.maximum(
        jnp.dot(x.astype(jnp.bfloat16), w1_ref[...],
                preferred_element_type=jnp.float32) + b1_ref[...], 0.0)
    # TODO(synk): dropout is identity (inference); training-mode stochastic dropout
    # (pltpu.prng_*) not implemented.
    y = jnp.dot(h.astype(jnp.bfloat16), w2_ref[...],
                preferred_element_type=jnp.float32) + b2_ref[...] + x
    d = y.shape[-1]
    mean = jnp.sum(y, axis=-1, keepdims=True) / d
    yc = y - mean
    var = jnp.sum(yc * yc, axis=-1, keepdims=True) / d        # two-pass, always >= 0
    o_ref[...] = (yc * jax.lax.rsqrt(var + 1e-5) * gamma_ref[...]
                  + beta_ref[...]).astype(o_ref.dtype)


def ffn_reduce_kernel(x_ref, w1_ref, b1_ref, w2_ref, b2_ref, gamma_ref, beta_ref,
                      o_ref, xb_ref):
    """Reduction path: d_ff tiled along the last ("arbitrary") grid axis.
    Accumulates fc2 partials directly into the VMEM-resident f32 output block."""
    k = pl.program_id(1)

    @pl.when(k == 0)
    def _():
        # Hoisted bf16 cast of x (reused for every k step) ...
        xb_ref[...] = x_ref[...].astype(jnp.bfloat16)
        # ... and fold residual + fc2 bias into the accumulator init (this step has
        # DMA slack; keeps the final-step epilogue short).
        o_ref[...] = x_ref[...] + b2_ref[...]

    h = jnp.maximum(
        jnp.dot(xb_ref[...], w1_ref[...],
                preferred_element_type=jnp.float32) + b1_ref[...], 0.0)
    # TODO(synk): dropout is identity (inference); training-mode dropout not implemented.
    o_ref[...] += jnp.dot(h.astype(jnp.bfloat16), w2_ref[...],
                          preferred_element_type=jnp.float32)

    @pl.when(k == pl.num_programs(1) - 1)
    def _():
        y = o_ref[...]
        d = y.shape[-1]
        mean = jnp.sum(y, axis=-1, keepdims=True) / d
        yc = y - mean
        var = jnp.sum(yc * yc, axis=-1, keepdims=True) / d
        o_ref[...] = (yc * jax.lax.rsqrt(var + 1e-5) * gamma_ref[...]
                      + beta_ref[...]).astype(o_ref.dtype)


# ----------------------------------------------------------------------------
# Wrapper
# ----------------------------------------------------------------------------
def _round_up(a, b):
    return -(-a // b) * b


def _pick_t_ff(d_ff, t_ff):
    """Largest multiple of 128 that divides d_ff and is <= t_ff; else full d_ff."""
    if d_ff <= t_ff:
        return d_ff
    best = d_ff
    for c in range(128, t_ff + 1, 128):
        if d_ff % c == 0:
            best = c
    return best


def _vmem_capacity_bytes():
    try:
        return int(pltpu.get_tpu_info().vmem_capacity_bytes)
    except Exception:
        return 64 * 1024 * 1024          # conservative: v7x per-TC VMEM


def _vmem_limit(footprint_bytes, cap_bytes):
    want = int(footprint_bytes * 1.25) + (8 << 20)
    return int(max(32 << 20, min(want, cap_bytes - (8 << 20), 100 << 20)))


def positionwise_feedforward(x, w1, b1, w2, b2, gamma, beta, *,
                             tm=512, t_ff=1024, force_reduce=False):
    """x: (B, S, d_model). w1: (d_model, d_ff), w2: (d_ff, d_model) (pre-transposed
    vs. PyTorch's (out, in) layout). Returns (B, S, d_model) in x.dtype."""
    B, S, d_model = x.shape
    d_ff = w1.shape[1]
    assert d_model % 128 == 0, "d_model must be a multiple of 128 (lane-dense layout)"
    assert d_ff % 128 == 0, "d_ff must be a multiple of 128"

    M = B * S
    x2 = x.reshape(M, d_model).astype(jnp.float32)

    # Token tile: as large as requested (arithmetic intensity ~ TM), multiple of 8
    # (f32 sublane), but keep >= 2 tiles along M so the parallel axis can be split
    # across TensorCores (megacore / v7x two-TC).
    TM = min(tm, _round_up(M, 8))
    if _round_up(M, TM) // TM < 2 and M > 8:
        TM = _round_up(pl.cdiv(M, 2), 8)
    M_pad = _round_up(M, TM)
    if M_pad != M:
        x2 = jnp.pad(x2, ((0, M_pad - M), (0, 0)))  # zero-pad ragged tail (sliced off)

    # bf16 weights: halves HBM/VMEM traffic, MXU-native dtype. f32 everywhere else.
    w1_bf = w1.astype(jnp.bfloat16)
    w2_bf = w2.astype(jnp.bfloat16)
    b1r = b1.reshape(1, d_ff).astype(jnp.float32)
    b2r = b2.reshape(1, d_model).astype(jnp.float32)
    gr = gamma.reshape(1, d_model).astype(jnp.float32)
    br = beta.reshape(1, d_model).astype(jnp.float32)

    vmem_cap = _vmem_capacity_bytes()

    # ---- fast path: weights resident in VMEM, no d_ff reduction axis ----------------
    resident_bytes = (2 * (d_model * d_ff * 2) * 2        # w1 + w2 bf16 (2-buffered)
                      + 2 * TM * d_model * 4 * 2          # x + out f32 (double-buffered)
                      + TM * d_ff * 4                     # (TM, d_ff) hidden slab f32
                      + TM * d_model * 4)                 # epilogue temporaries
    use_fast = (not force_reduce) and resident_bytes <= int(0.6 * vmem_cap)

    if use_fast:
        grid = (M_pad // TM,)
        out2 = pl.pallas_call(
            ffn_resident_kernel,
            out_shape=jax.ShapeDtypeStruct((M_pad, d_model), jnp.float32),
            grid_spec=pltpu.PrefetchScalarGridSpec(
                num_scalar_prefetch=0,
                grid=grid,
                in_specs=[
                    pl.BlockSpec((TM, d_model), lambda i: (i, 0)),     # x
                    pl.BlockSpec((d_model, d_ff), lambda i: (0, 0)),   # w1 (resident)
                    pl.BlockSpec((1, d_ff), lambda i: (0, 0)),         # b1
                    pl.BlockSpec((d_ff, d_model), lambda i: (0, 0)),   # w2 (resident)
                    pl.BlockSpec((1, d_model), lambda i: (0, 0)),      # b2
                    pl.BlockSpec((1, d_model), lambda i: (0, 0)),      # gamma
                    pl.BlockSpec((1, d_model), lambda i: (0, 0)),      # beta
                ],
                out_specs=pl.BlockSpec((TM, d_model), lambda i: (i, 0)),
            ),
            compiler_params=pltpu.CompilerParams(
                dimension_semantics=("parallel",),
                vmem_limit_bytes=_vmem_limit(resident_bytes, vmem_cap),
            ),
        )(x2, w1_bf, b1r, w2_bf, b2r, gr, br)
    else:
        # ---- reduction path: tile d_ff along a trailing "arbitrary" grid axis -------
        T_FF = _pick_t_ff(d_ff, t_ff)
        reduce_bytes = (2 * TM * d_model * 4 * 2          # x + out f32 (double-buffered)
                        + 2 * d_model * T_FF * 2          # w1 slab bf16 (double-buffered)
                        + 2 * T_FF * d_model * 2          # w2 slab bf16 (double-buffered)
                        + TM * d_model * 2                # xb bf16 scratch
                        + TM * T_FF * 4)                  # (TM, T_FF) hidden slab f32
        grid = (M_pad // TM, d_ff // T_FF)
        out2 = pl.pallas_call(
            ffn_reduce_kernel,
            out_shape=jax.ShapeDtypeStruct((M_pad, d_model), jnp.float32),
            grid_spec=pltpu.PrefetchScalarGridSpec(
                num_scalar_prefetch=0,
                grid=grid,
                in_specs=[
                    pl.BlockSpec((TM, d_model), lambda i, k: (i, 0)),    # x (resident over k)
                    pl.BlockSpec((d_model, T_FF), lambda i, k: (0, k)),  # w1 slab
                    pl.BlockSpec((1, T_FF), lambda i, k: (0, k)),        # b1 slab
                    pl.BlockSpec((T_FF, d_model), lambda i, k: (k, 0)),  # w2 slab
                    pl.BlockSpec((1, d_model), lambda i, k: (0, 0)),     # b2
                    pl.BlockSpec((1, d_model), lambda i, k: (0, 0)),     # gamma
                    pl.BlockSpec((1, d_model), lambda i, k: (0, 0)),     # beta
                ],
                out_specs=pl.BlockSpec((TM, d_model), lambda i, k: (i, 0)),
                scratch_shapes=[pltpu.VMEM((TM, d_model), jnp.bfloat16)],  # hoisted x cast
            ),
            compiler_params=pltpu.CompilerParams(
                dimension_semantics=("parallel", "arbitrary"),
                vmem_limit_bytes=_vmem_limit(reduce_bytes, vmem_cap),
            ),
        )(x2, w1_bf, b1r, w2_bf, b2r, gr, br)

    return out2[:M].reshape(B, S, d_model).astype(x.dtype)


# ----------------------------------------------------------------------------
# Demo / correctness check
# ----------------------------------------------------------------------------
if __name__ == "__main__":
    # Small but tiling-exercising shapes: >= 2 token tiles along M, 2 reduction steps
    # along d_ff on the reduction path, d_model a multiple of 128 (lane-dense stores).
    B, S, d_model, d_ff = 2, 64, 128, 512

    key = jax.random.PRNGKey(0)
    kx, k1, k2, k3, k4 = jax.random.split(key, 5)

    x = jax.random.normal(kx, (B, S, d_model), dtype=jnp.float32)

    # PyTorch Linear weight is (out, in); we store the transpose (in, out).
    lim1 = 1.0 / (d_model ** 0.5)
    lim2 = 1.0 / (d_ff ** 0.5)
    w1 = jax.random.uniform(k1, (d_model, d_ff), jnp.float32, -lim1, lim1)
    b1 = jax.random.uniform(k2, (d_ff,), jnp.float32, -lim1, lim1)
    w2 = jax.random.uniform(k3, (d_ff, d_model), jnp.float32, -lim2, lim2)
    b2 = jax.random.uniform(k4, (d_model,), jnp.float32, -lim2, lim2)
    gamma = jnp.ones((d_model,), jnp.float32)   # LayerNorm default init
    beta = jnp.zeros((d_model,), jnp.float32)

    # Exercise both paths: resident-weights fast path and d_ff reduction path.
    out_fast = positionwise_feedforward(x, w1, b1, w2, b2, gamma, beta)
    out_fast = jax.block_until_ready(out_fast)
    out_red = positionwise_feedforward(x, w1, b1, w2, b2, gamma, beta,
                                       tm=64, t_ff=256, force_reduce=True)
    out_red = jax.block_until_ready(out_red)

    # Reference with the same bf16-matmul / f32-accumulate recipe (dropout = identity).
    xf = x.reshape(-1, d_model)
    h_ref = jnp.maximum(
        jnp.dot(xf.astype(jnp.bfloat16), w1.astype(jnp.bfloat16),
                preferred_element_type=jnp.float32) + b1, 0.0)
    y_ref = jnp.dot(h_ref.astype(jnp.bfloat16), w2.astype(jnp.bfloat16),
                    preferred_element_type=jnp.float32) + b2 + xf
    mu = jnp.mean(y_ref, axis=-1, keepdims=True)
    var = jnp.mean((y_ref - mu) ** 2, axis=-1, keepdims=True)
    ref = ((y_ref - mu) * jax.lax.rsqrt(var + 1e-5) * gamma + beta).reshape(B, S, d_model)

    assert jnp.allclose(out_fast, ref, atol=2e-3, rtol=2e-3), "fast path mismatch vs bf16 ref"
    assert jnp.allclose(out_red, ref, atol=2e-3, rtol=2e-3), "reduce path mismatch vs bf16 ref"

    # Loose sanity check vs full-f32 math (bf16 matmul error budget).
    hf = jnp.maximum(xf @ w1 + b1, 0.0)
    yf = hf @ w2 + b2 + xf
    muf = jnp.mean(yf, axis=-1, keepdims=True)
    varf = jnp.mean((yf - muf) ** 2, axis=-1, keepdims=True)
    reff = ((yf - muf) / jnp.sqrt(varf + 1e-5) * gamma + beta).reshape(B, S, d_model)
    assert jnp.allclose(out_fast, reff, atol=5e-2, rtol=5e-2), "mismatch vs f32 reference"
    assert jnp.allclose(out_red, reff, atol=5e-2, rtol=5e-2), "mismatch vs f32 reference"

    print("KERNEL_OK")
</pallas_src>

<mosaic_0001>
module attributes {stable_mosaic.version = 11 : i64} {
  func.func @ffn_resident_kernel(%arg0: i32, %arg1: memref<64x128xf32, #tpu.memory_space<vmem>>, %arg2: memref<128x512xbf16, #tpu.memory_space<vmem>>, %arg3: memref<1x512xf32, #tpu.memory_space<vmem>>, %arg4: memref<512x128xbf16, #tpu.memory_space<vmem>>, %arg5: memref<1x128xf32, #tpu.memory_space<vmem>>, %arg6: memref<1x128xf32, #tpu.memory_space<vmem>>, %arg7: memref<1x128xf32, #tpu.memory_space<vmem>>, %arg8: memref<64x128xf32, #tpu.memory_space<vmem>>) attributes {dimension_semantics = [#tpu.dimension_semantics<parallel>], iteration_bounds = array<i64: 2>, scalar_prefetch = 0 : i64, scratch_operands = 0 : i64, tpu.core_type = #tpu.core_type<tc>, window_params = [{transform_indices = @transform_0, window_bounds = array<i64: 64, 128>}, {pipeline_mode = #tpu.pipeline_mode<synchronous>, transform_indices = @transform_1, window_bounds = array<i64: 128, 512>}, {pipeline_mode = #tpu.pipeline_mode<synchronous>, transform_indices = @transform_2, window_bounds = array<i64: 1, 512>}, {pipeline_mode = #tpu.pipeline_mode<synchronous>, transform_indices = @transform_3, window_bounds = array<i64: 512, 128>}, {pipeline_mode = #tpu.pipeline_mode<synchronous>, transform_indices = @transform_4, window_bounds = array<i64: 1, 128>}, {pipeline_mode = #tpu.pipeline_mode<synchronous>, transform_indices = @transform_5, window_bounds = array<i64: 1, 128>}, {pipeline_mode = #tpu.pipeline_mode<synchronous>, transform_indices = @transform_6, window_bounds = array<i64: 1, 128>}, {transform_indices = @transform_7, window_bounds = array<i64: 64, 128>}]} {
    %c0 = arith.constant 0 : index
    %c0_0 = arith.constant 0 : index
    %0 = vector.load %arg1[%c0, %c0_0] : memref<64x128xf32, #tpu.memory_space<vmem>>, vector<64x128xf32>
    %1 = arith.truncf %0 : vector<64x128xf32> to vector<64x128xbf16>
    %c0_1 = arith.constant 0 : index
    %c0_2 = arith.constant 0 : index
    %2 = vector.load %arg2[%c0_1, %c0_2] : memref<128x512xbf16, #tpu.memory_space<vmem>>, vector<128x512xbf16>
    %cst = arith.constant dense<0.000000e+00> : vector<64x512xf32>
    %3 = tpu.matmul %1, %2, %cst {dimension_numbers = #tpu.dot_dimension_numbers<[1], [0], [0], [1], [0, 0, 1, 1], [], []>} : vector<64x128xbf16>, vector<128x512xbf16>, vector<64x512xf32> -> vector<64x512xf32>
    %c0_3 = arith.constant 0 : index
    %c0_4 = arith.constant 0 : index
    %4 = vector.load %arg3[%c0_3, %c0_4] : memref<1x512xf32, #tpu.memory_space<vmem>>, vector<1x512xf32>
    %5 = vector.broadcast %4 : vector<1x512xf32> to vector<64x512xf32>
    %6 = arith.addf %3, %5 : vector<64x512xf32>
    %cst_5 = arith.constant 0.000000e+00 : f32
    %7 = vector.broadcast %cst_5 : f32 to vector<64x512xf32>
    %8 = arith.maximumf %6, %7 : vector<64x512xf32>
    %9 = arith.truncf %8 : vector<64x512xf32> to vector<64x512xbf16>
    %c0_6 = arith.constant 0 : index
    %c0_7 = arith.constant 0 : index
    %10 = vector.load %arg4[%c0_6, %c0_7] : memref<512x128xbf16, #tpu.memory_space<vmem>>, vector<512x128xbf16>
    %cst_8 = arith.constant dense<0.000000e+00> : vector<64x128xf32>
    %11 = tpu.matmul %9, %10, %cst_8 {dimension_numbers = #tpu.dot_dimension_numbers<[1], [0], [0], [1], [0, 0, 1, 1], [], []>} : vector<64x512xbf16>, vector<512x128xbf16>, vector<64x128xf32> -> vector<64x128xf32>
    %c0_9 = arith.constant 0 : index
    %c0_10 = arith.constant 0 : index
    %12 = vector.load %arg5[%c0_9, %c0_10] : memref<1x128xf32, #tpu.memory_space<vmem>>, vector<1x128xf32>
    %13 = vector.broadcast %12 : vector<1x128xf32> to vector<64x128xf32>
    %14 = arith.addf %11, %13 : vector<64x128xf32>
    %15 = arith.addf %14, %0 : vector<64x128xf32>
    %cst_11 = arith.constant dense<0.000000e+00> : vector<64xf32>
    %16 = vector.multi_reduction <add>, %15, %cst_11 [1] : vector<64x128xf32> to vector<64xf32>
    %17 = vector.shape_cast %16 : vector<64xf32> to vector<64x1xf32>
    %cst_12 = arith.constant 1.280000e+02 : f32
    %18 = vector.broadcast %cst_12 : f32 to vector<64x1xf32>
    %19 = arith.divf %17, %18 : vector<64x1xf32>
    %20 = vector.broadcast %19 : vector<64x1xf32> to vector<64x128xf32>
    %21 = arith.subf %15, %20 : vector<64x128xf32>
    %22 = arith.mulf %21, %21 : vector<64x128xf32>
    %cst_13 = arith.constant dense<0.000000e+00> : vector<64xf32>
    %23 = vector.multi_reduction <add>, %22, %cst_13 [1] : vector<64x128xf32> to vector<64xf32>
    %24 = vector.shape_cast %23 : vector<64xf32> to vector<64x1xf32>
    %cst_14 = arith.constant 1.280000e+02 : f32
    %25 = vector.broadcast %cst_14 : f32 to vector<64x1xf32>
    %26 = arith.divf %24, %25 : vector<64x1xf32>
    %cst_15 = arith.constant 9.99999974E-6 : f32
    %27 = vector.broadcast %cst_15 : f32 to vector<64x1xf32>
    %28 = arith.addf %26, %27 : vector<64x1xf32>
    %29 = math.rsqrt %28 : vector<64x1xf32>
    %30 = vector.broadcast %29 : vector<64x1xf32> to vector<64x128xf32>
    %31 = arith.mulf %21, %30 : vector<64x128xf32>
    %c0_16 = arith.constant 0 : index
    %c0_17 = arith.constant 0 : index
    %32 = vector.load %arg6[%c0_16, %c0_17] : memref<1x128xf32, #tpu.memory_space<vmem>>, vector<1x128xf32>
    %33 = vector.broadcast %32 : vector<1x128xf32> to vector<64x128xf32>
    %34 = arith.mulf %31, %33 : vector<64x128xf32>
    %c0_18 = arith.constant 0 : index
    %c0_19 = arith.constant 0 : index
    %35 = vector.load %arg7[%c0_18, %c0_19] : memref<1x128xf32, #tpu.memory_space<vmem>>, vector<1x128xf32>
    %36 = vector.broadcast %35 : vector<1x128xf32> to vector<64x128xf32>
    %37 = arith.addf %34, %36 : vector<64x128xf32>
    %c0_20 = arith.constant 0 : index
    %c0_21 = arith.constant 0 : index
    %38 = vector.load %arg8[%c0_20, %c0_21] : memref<64x128xf32, #tpu.memory_space<vmem>>, vector<64x128xf32>
    tpu.vector_store %arg8[%c0_20, %c0_21], %37 {strides = array<i32>} : memref<64x128xf32, #tpu.memory_space<vmem>>, vector<64x128xf32>,
    return
  }
  func.func @transform_0(%arg0: i32) -> (i32, i32) {
    %c0_i32 = arith.constant 0 : i32
    %c0_i32_0 = arith.constant 0 : i32
    return %arg0, %c0_i32 : i32, i32
  }
  func.func @transform_1(%arg0: i32) -> (i32, i32) {
    %c0_i32 = arith.constant 0 : i32
    %c0_i32_0 = arith.constant 0 : i32
    %c0_i32_1 = arith.constant 0 : i32
    return %c0_i32, %c0_i32_0 : i32, i32
  }
  func.func @transform_2(%arg0: i32) -> (i32, i32) {
    %c0_i32 = arith.constant 0 : i32
    %c0_i32_0 = arith.constant 0 : i32
    %c0_i32_1 = arith.constant 0 : i32
    return %c0_i32, %c0_i32_0 : i32, i32
  }
  func.func @transform_3(%arg0: i32) -> (i32, i32) {
    %c0_i32 = arith.constant 0 : i32
    %c0_i32_0 = arith.constant 0 : i32
    %c0_i32_1 = arith.constant 0 : i32
    return %c0_i32, %c0_i32_0 : i32, i32
  }
  func.func @transform_4(%arg0: i32) -> (i32, i32) {
    %c0_i32 = arith.constant 0 : i32
    %c0_i32_0 = arith.constant 0 : i32
    %c0_i32_1 = arith.constant 0 : i32
    return %c0_i32, %c0_i32_0 : i32, i32
  }
  func.func @transform_5(%arg0: i32) -> (i32, i32) {
    %c0_i32 = arith.constant 0 : i32
    %c0_i32_0 = arith.constant 0 : i32
    %c0_i32_1 = arith.constant 0 : i32
    return %c0_i32, %c0_i32_0 : i32, i32
  }
  func.func @transform_6(%arg0: i32) -> (i32, i32) {
    %c0_i32 = arith.constant 0 : i32
    %c0_i32_0 = arith.constant 0 : i32
    %c0_i32_1 = arith.constant 0 : i32
    return %c0_i32, %c0_i32_0 : i32, i32
  }
  func.func @transform_7(%arg0: i32) -> (i32, i32) {
    %c0_i32 = arith.constant 0 : i32
    %c0_i32_0 = arith.constant 0 : i32
    return %arg0, %c0_i32 : i32, i32
  }
}

</mosaic_0001>

<bundles_post_ra>
// kernel: tpu_custom_call.1
= control target key start
LH: loop header
LB: loop body
LE: loop exit
PB: predicated region body
PF: predicated region fallthrough
CT: control target
= control target key end

     0   :  { %s2354_s0 = inlined_call_operand.hbm [shape: f32[128,128], index: 0, kind: input, shape index: {}]   ;;  %s2355_s1 = inlined_call_operand.hbm [shape: bf16[128,512], index: 1, kind: input, shape index: {}]   ;;  %s2356_s2 = inlined_call_operand.hbm [shape: f32[1,512], index: 2, kind: input, shape index: {}]   ;;  %s2357_s3 = inlined_call_operand.hbm [shape: bf16[512,128], index: 3, kind: input, shape index: {}]   ;;  %s2358_s4 = inlined_call_operand.vmem [shape: f32[1,128], index: 4, kind: input, shape index: {}]   ;;  %s2359_s5 = inlined_call_operand.vmem [shape: f32[1,128], index: 5, kind: input, shape index: {}]   ;;  %s2360_s6 = inlined_call_operand.vmem [shape: f32[1,128], index: 6, kind: input, shape index: {}]   ;;  %s2361_s7 = inlined_call_operand.hbm [shape: f32[128,128], index: 7, kind: output, shape index: {}]  }
   0x1   :  { %2366 = sst [smem:[#allocation15_spill]] %s2355_s1 }
   0x2   :  { %12 = vsyncpa [#allocation3], 0 }
   0x3   :  { %14 = vsyncpa [#allocation3 + $0x1], 0 }
   0x4   :  { %15 = vsyncpa [#allocation6], 0 }
   0x5   :  { %16 = vsyncpa [#allocation9], 0 }
   0x6   :  { %17 = vsyncpa [#allocation4], 0 }
   0x7   :  { %19 = vsyncpa [#allocation4 + $0x1], 0  ;;  %s1991_s24 = smov 0   ;;  %s1993_s25 = smov 0  }
   0x8   :  { %s1995_s26 = smov 0   ;;  %s1997_s27 = smov 0  }
   0x9 LB: > { %s2012_s28 = sadd.s32 4294967295, %s1935_s27   ;;  %s1406_s29 = sadd.s32 4294967294, %s1935_s27   ;;  %s1935_s27 = sphi %s1997_s27, %s2387_s27   ;;  %s1931_s26 = sphi %s1995_s26, %s2386_s26   ;;  %s1927_s25 = sphi %s1993_s25, %s2385_s25   ;;  %s1923_s24 = sphi %s1991_s24, %s2384_s24  }
   0xa   : > { %p45_p0 = scmp.ne.s32.totalorder %s1927_s25, %s1923_s24  ;;  %p2362_p1 = scmp.eq.s32.totalorder %s2012_s28, 0 }
   0xb   : > { %p201_p3 = scmp.eq.s32.totalorder %s1406_s29, 1  ;;  %p1407_p5 = scmp.ge.s32.totalorder %s1935_s27, 1 }
   0xc   : > { %p2021_p4 = por %p2362_p1, %p45_p0  ;;  %p208_p7 = scmp.lt.s32.totalorder %s1935_s27, 3 }
   0xd   : > { %p2026_p6 = por %p201_p3, %p45_p0  ;;  %s1937_s10 = smov [#allocation5]  }
   0xe   : > { %s2367_s30 = scalar_select %p2021_p4, 1, 0 }
   0xf   : > { %s2368_s8 = scalar_select %p2026_p6, 1, 0 }
  0x10   : > { %p2031_p8 = pnand %p1407_p5, %p208_p7  ;;  %s220_s11 = sshll.u32 %s1937_s10, 4  ;;  %s221_s11 = int_to_ptr.vmem [resolvable:$true] %s220_s11 }
  0x11   : > { %s1938_s13 = smov [#allocation7]   ;;  %s1939_s15 = smov [#allocation8]  }
  0x12   : > { %s2369_s9 = scalar_select %p2031_p8, 1, 0 }
  0x13   : > { %p1591_p9 = pneg %p2031_p8  ;;  %s234_s14 = sshll.u32 %s1938_s13, 4  ;;  %s235_s14 = int_to_ptr.vmem [resolvable:$true] %s234_s14 }
  0x14   : > { %s244_s16 = sshll.u32 %s1939_s15, 4  ;;  %s1768_s17 = scalar_lea.vmem %s221_s11, 4096  ;;  %s245_s16 = int_to_ptr.vmem [resolvable:$true] %s244_s16 }
  0x15   : > { %p2040_p11 = pnand %p1591_p9, %p2362_p1  ;;  %p1769_p13 = scmp.ne.s32.totalorder %s221_s11, %s1768_s17 }
  0x16   : > { %p1776_p5 = scmp.lt.s32.totalorder %s221_s11, %s221_s11  ;;  %p1777_p7 = scmp.lt.s32.totalorder %s1768_s17, %s1768_s17 }
  0x17   : > { %p1759_p12 = pneg %p2040_p11 }
  0x18   : > { %p1778_p9 = por %p1777_p7, %p1776_p5 }
  0x19   : > { %p1771_p0 = pnand %p1769_p13, %p1759_p12 }
  0x1b   : > { %p1772_p3 = pneg %p1771_p0 }
  0x1d   : > { %p1779_p10 = pnand %p1778_p9, %p1772_p3 }
  0x1f   : > { %1782 = shalt.err (!%p1779_p10)
}
  0x20   : > { %s1940_s18 = smov 256   ;;  %s1941_s19 = smov 16  }
  0x21   : > { %s2371_s1 = sld [smem:[#allocation15_spill]]  ;;  %s1794_s22 = scalar_lea.vmem %s235_s14, 64 }
  0x22   : > { %p1795_p1 = scmp.ne.s32.totalorder %s235_s14, %s1794_s22  ;;  %p1802_p2 = scmp.lt.s32.totalorder %s235_s14, %s235_s14 }
  0x23   : > { %p1803_p6 = scmp.lt.s32.totalorder %s1794_s22, %s1794_s22 }
  0x24   : > { %p1797_p13 = pnand %p1795_p1, %p1759_p12 }
  0x25   : > { %p1804_p5 = por %p1803_p6, %p1802_p2 }
  0x26   : > { %p1798_p0 = pneg %p1797_p13 }
  0x27   : > { %1594 = dma.hbm_to_vmem [thread:$0]  (!%p2040_p11), %s2371_s1, 4096, %s221_s11, [#allocation6], %s1940_s18, %s1940_s18, %s1941_s19  }
  0x28   : > { %p1805_p3 = pnand %p1804_p5, %p1798_p0 }
  0x2a   : > { %1808 = shalt.err (!%p1805_p3)
}
  0x2b   : > { %1597 = dma.hbm_to_vmem [thread:$0]  (!%p2040_p11), %s2356_s2, 64, %s235_s14, [#allocation6]  }
  0x2c   : > { %s1820_s10 = scalar_lea.vmem %s245_s16, 4096  ;;  %p1828_p9 = scmp.lt.s32.totalorder %s245_s16, %s245_s16 }
  0x2d   : > { %p1821_p10 = scmp.ne.s32.totalorder %s245_s16, %s1820_s10  ;;  %p1829_p13 = scmp.lt.s32.totalorder %s1820_s10, %s1820_s10 }
  0x2f   : > { %p1823_p7 = pnand %p1821_p10, %p1759_p12  ;;  %p1830_p4 = por %p1829_p13, %p1828_p9 }
  0x31   : > { %p1824_p1 = pneg %p1823_p7 }
  0x33   : > { %p1831_p2 = pnand %p1830_p4, %p1824_p1 }
  0x35   : > { %1834 = shalt.err (!%p1831_p2)
}
  0x36   : > { %s1942_s11 = smov 64   ;;  %s1943_s13 = smov 4  }
  0x37   : > { %1600 = dma.hbm_to_vmem [thread:$0]  (!%p2040_p11), %s2357_s3, 4096, %s245_s16, [#allocation9], %s1942_s11, %s1942_s11, %s1943_s13  }
  0x38   : > { %s2071_s17 = sadd.s32 1, %s1935_s27   ;;  %s32_s19 = sadd.s32 1, %s1931_s26 }
  0x39   : > { %s29_s18 = ssub.s32 %s1935_s27, %s2071_s17  ;;  %p39_p6 = scmp.ne.s32.totalorder %s1931_s26, %s1927_s25 }
  0x3a   : > { %p30_p4 = scmp.eq.s32.totalorder %s29_s18, 0  ;;  %p40_p12 = scmp.eq.s32.totalorder %s1935_s27, 0 }
  0x3b   : > { %p1612_p0 = scmp.lt.s32.totalorder %s1935_s27, 2  ;;  %p2372_p3 = scmp.eq.s32.totalorder %s2012_s28, 1 }
  0x3c   : > { %s2081_s20 = scalar_select %p30_p4, %s1931_s26, %s32_s19  }
  0x3d   : > { %p41_p5 = por %p40_p12, %p39_p6  ;;  %p2085_p10 = por %p2372_p3, %p39_p6 }
  0x3e   : > { %s267_s12 = sand.u32 1, %s1931_s26   ;;  %s1493_s22 = sshll.u32 %s1935_s27, 10 }
  0x3f   : > { %s2373_s21 = scalar_select %p2085_p10, 1, 0 }
  0x40   : > { %s1412_s16 = sshll.u32 %s267_s12, 6  ;;  %s2094_s10 = scalar_lea.hbm %s2354_s0, %s1493_s22 }
  0x41   : > { %s271_s11 = scalar_lea.vmem [#allocation2], %s1412_s16  ;;  %p2096_p11 = pnand %p1612_p0, %p41_p5 }
  0x42   : > { %s278_s13 = sshll.u32 %s271_s11, 4  ;;  %s2102_s15 = scalar_lea.sflag [#allocation3], %s267_s12  ;;  %s2100_s13 = int_to_ptr.vmem [resolvable:$true] %s278_s13 }
  0x43   : > { %s1835_s18 = scalar_lea.hbm %s2094_s10, 1024  ;;  %p1837_p1 = pneg %p2096_p11 }
  0x44   : > { %p1836_p7 = scmp.ne.s32.totalorder %s2094_s10, %s1835_s18  ;;  %s1840_s16 = scalar_lea.hbm %s2354_s0, 2048 }
  0x45   : > { %p1841_p2 = scmp.lt.s32.totalorder %s2094_s10, %s2354_s0  ;;  %p1842_p4 = scmp.lt.s32.totalorder %s1840_s16, %s1835_s18 }
  0x46   : > { %p1838_p9 = pnand %p1837_p1, %p1836_p7 }
  0x47   : > { %p1843_p6 = por %p1842_p4, %p1841_p2 }
  0x48   : > { %p1839_p13 = pneg %p1838_p9 }
  0x4a   : > { %p1844_p12 = pnand %p1843_p6, %p1839_p13 }
  0x4c   : > { %1847 = shalt.err (!%p1844_p12)
}
  0x4d   : > { %s1848_s12 = scalar_lea.vmem %s2100_s13, 1024  ;;  %s1944_s11 = smov [#allocation2]  }
  0x4e   : > { %p1849_p0 = scmp.ne.s32.totalorder %s2100_s13, %s1848_s12  ;;  %s1853_s1 = sshll.u32 %s1944_s11, 4  ;;  %s1854_s1 = int_to_ptr.vmem [resolvable:$false] %s1853_s1 }
  0x4f   : > { %s1855_s19 = scalar_lea.vmem %s1854_s1, 2048  ;;  %p1856_p7 = scmp.lt.s32.totalorder %s2100_s13, %s1854_s1 }
  0x50   : > { %p1851_p5 = pnand %p1849_p0, %p1837_p1  ;;  %p1857_p9 = scmp.lt.s32.totalorder %s1855_s19, %s1848_s12 }
  0x52   : > { %p1852_p3 = pneg %p1851_p5  ;;  %p1858_p10 = por %p1857_p9, %p1856_p7 }
  0x54   : > { %p1859_p8 = pnand %p1858_p10, %p1852_p3 }
  0x56   : > { %1862 = shalt.err (!%p1859_p8)
}
  0x57   : > { %s1945_s18 = smov 128   ;;  %s1946_s22 = smov 8  }
  0x58   : > { %1604 = dma.hbm_to_vmem [thread:$0]  (!%p2096_p11), %s2094_s10, 1024, %s2100_s13, %s2102_s15, %s1945_s18, %s1945_s18, %s1946_s22  }
  0x59   : > { %p2375_p1 = scmp.ne.s32.totalorder %s2369_s9, 0 }
  0x5a   : > { %s2126_s16 = sand.u32 (!%p2375_p1), 1, %s1927_s25   ;;  %p2376_p8 = scmp.ne.s32.totalorder (!%p2375_p1), %s2367_s30, 0 }
  0x5b   : > { %290 = sbr.rel (%p2375_p1) target bundleno = 894 (0x37e), region = 48  ;;  %s1416_s1 = sshll.u32 (!%p2375_p1), %s2126_s16, 6 }
  0x5c   : > { %s293_s23 = scalar_lea.sflag (!%p2375_p1), [#allocation3], %s2126_s16  ;;  %s2132_s29 = scalar_lea.vmem (!%p2375_p1), [#allocation2], %s1416_s1 }
  0x60   : > { %1906 = dma.done.wait (%p2376_p8), %s293_s23, 1024  }
  0x61   : > { %1908 = vsyncadd (%p2376_p8), %s293_s23, 4294966272  ;;  %p2377_p10 = scmp.eq.s32.totalorder %s2012_s28, 0 }
  0x63   : > { %1910 = dma.done.wait (%p2377_p10), [#allocation6], 4160   ;;  %p2378_p11 = pmov %p2377_p10 }
  0x64   : > { %p2379_p13 = pmov %p2377_p10 }
  0x65   : > { %1912 = vsyncadd (%p2378_p11), [#allocation6], 4294963136 }
  0x66   : > { %1914 = dma.done.wait (%p2379_p13), [#allocation9], 4096   ;;  %p2380_p2 = pmov %p2377_p10 }
  0x67   : > { %v1947_v0 = vmov 0   ;;  %v1661_v1 = vld [vmem:[#allocation5 + $0xe4] ss:$16 sps:$4 sm:$0xff]   ;;  %v1663_v2 = vld [vmem:[#allocation5 + $0xec] ss:$16 sps:$4 sm:$0xff]   ;;  %s2288_s12 = scalar_lea.vmem [#allocation10], %s1416_s1 }
  0x68   : > { %1916 = vsyncadd (%p2380_p2), [#allocation9], 4294963200  ;;  %600 = vmatprep.mubr.bf16.mxu0 %v1947_v0  ;;  %673 = vmatprep.mubr.bf16.mxu1 %v1947_v0  ;;  %v1665_v3 = vld [vmem:[#allocation5 + $0xe0] ss:$16 sps:$4 sm:$0xff]   ;;  %v1666_v4 = vld [vmem:[#allocation5 + $0xe8] ss:$16 sps:$4 sm:$0xff]  }
  0x69   : > { %568 = vmatprep.subr.bf16.mxu0 %v1661_v1  ;;  %641 = vmatprep.subr.bf16.mxu1 %v1663_v2  ;;  %v1667_v5 = vld [vmem:[#allocation5 + $0xc4] ss:$16 sps:$4 sm:$0xff]   ;;  %v1669_v6 = vld [vmem:[#allocation5 + $0xcc] ss:$16 sps:$4 sm:$0xff]   ;;  %v1671_v7 = vld [vmem:[#allocation5 + $0xc0] ss:$16 sps:$4 sm:$0xff]  }
  0x6a   : > { %569 = vmatpush1.bf16.msra.mxu0 %v1665_v3  ;;  %642 = vmatpush1.bf16.msra.mxu1 %v1666_v4  ;;  %v1672_v8 = vld [vmem:[#allocation5 + $0xc8] ss:$16 sps:$4 sm:$0xff]   ;;  %v1673_v9 = vld [vmem:[#allocation5 + $0xa4] ss:$16 sps:$4 sm:$0xff]   ;;  %v1675_v10 = vld [vmem:[#allocation5 + $0xac] ss:$16 sps:$4 sm:$0xff]  }
  0x6b   : > { %570 = vmatprep.subr.bf16.mxu0 %v1667_v5  ;;  %643 = vmatprep.subr.bf16.mxu1 %v1669_v6  ;;  %v1677_v11 = vld [vmem:[#allocation5 + $0xa0] ss:$16 sps:$4 sm:$0xff]   ;;  %v1678_v12 = vld [vmem:[#allocation5 + $0xa8] ss:$16 sps:$4 sm:$0xff]   ;;  %v1679_v13 = vld [vmem:[#allocation5 + $0x84] ss:$16 sps:$4 sm:$0xff]  }
  0x6c   : > { %v1681_v14 = vld [vmem:[#allocation5 + $0x8c] ss:$16 sps:$4 sm:$0xff]   ;;  %v1683_v15 = vld [vmem:[#allocation5 + $0x80] ss:$16 sps:$4 sm:$0xff]   ;;  %v1684_v16 = vld [vmem:[#allocation5 + $0x88] ss:$16 sps:$4 sm:$0xff]  }
  0x6d   : > { %v1685_v17 = vld [vmem:[#allocation5 + $0x64] ss:$16 sps:$4 sm:$0xff]   ;;  %v1687_v18 = vld [vmem:[#allocation5 + $0x6c] ss:$16 sps:$4 sm:$0xff]   ;;  %v1689_v19 = vld [vmem:[#allocation5 + $0x60] ss:$16 sps:$4 sm:$0xff]  }
  0x6e   : > { %571 = vmatpush1.bf16.msra.mxu0 %v1671_v7  ;;  %644 = vmatpush1.bf16.msra.mxu1 %v1672_v8  ;;  %v1690_v20 = vld [vmem:[#allocation5 + $0x68] ss:$16 sps:$4 sm:$0xff]   ;;  %v1691_v21 = vld [vmem:[#allocation5 + $0x44] ss:$16 sps:$4 sm:$0xff]   ;;  %v1693_v22 = vld [vmem:[#allocation5 + $0x4c] ss:$16 sps:$4 sm:$0xff]  }
  0x6f   : > { %572 = vmatprep.subr.bf16.mxu0 %v1673_v9  ;;  %645 = vmatprep.subr.bf16.mxu1 %v1675_v10  ;;  %v1695_v23 = vld [vmem:[#allocation5 + $0x40] ss:$16 sps:$4 sm:$0xff]   ;;  %v1696_v24 = vld [vmem:[#allocation5 + $0x48] ss:$16 sps:$4 sm:$0xff]   ;;  %v1697_v25 = vld [vmem:[#allocation5 + $0x24] ss:$16 sps:$4 sm:$0xff]  }
  0x70   : > { %v1699_v26 = vld [vmem:[#allocation5 + $0x2c] ss:$16 sps:$4 sm:$0xff]   ;;  %v1701_v27 = vld [vmem:[#allocation5 + $0x20] ss:$16 sps:$4 sm:$0xff]   ;;  %v1702_v28 = vld [vmem:[#allocation5 + $0x28] ss:$16 sps:$4 sm:$0xff]  }
  0x71   : > { %v1703_v29 = vld [vmem:[#allocation5 + $0x4] ss:$16 sps:$4 sm:$0xff]   ;;  %v1705_v30 = vld [vmem:[#allocation5 + $0xc] ss:$16 sps:$4 sm:$0xff]   ;;  %v1707_v31 = vld [vmem:[#allocation5] ss:$16 sps:$4 sm:$0xff]  }
  0x72   : > { %573 = vmatpush1.bf16.msra.mxu0 %v1677_v11  ;;  %646 = vmatpush1.bf16.msra.mxu1 %v1678_v12  ;;  %v1708_v32 = vld [vmem:[#allocation5 + $0x8] ss:$16 sps:$4 sm:$0xff]   ;;  %v2149_v33 = vld [vmem:[%s2132_s29] sm:$0xff]  ;;  %v2157_v41 = vld [vmem:[%s2132_s29 + $0x10] sm:$0xff]  ;;  %s1494_s11 = sshll.u32 %s2012_s28, 10  ;;  %s1304_s19 = sshll.u32 %s2288_s12, 4  ;;  %s2310_s19 = int_to_ptr.vmem [resolvable:$true] %s1304_s19 }
  0x73   : > { %574 = vmatprep.subr.bf16.mxu0 %v1679_v13  ;;  %647 = vmatprep.subr.bf16.mxu1 %v1681_v14  ;;  %v2152_v34 = vld [vmem:[%s2132_s29 + $0x8] sm:$0xff]  ;;  %v1709_v35 = vld [vmem:[#allocation8 + $0x78] sm:$0xff]   ;;  %v1713_v40 = vld [vmem:[#allocation8 + $0x70] sm:$0xff]   ;;  %v388_v13 = vlaneseq  ;;  %s2308_s1 = scalar_lea.hbm %s2361_s7, %s1494_s11  ;;  %s1291_s23 = scalar_lea.sflag [#allocation4], %s2126_s16 }
  0x74   : > { %v1711_v36 = vld [vmem:[#allocation8 + $0xf8] sm:$0xff]   ;;  %v350_v37 = vpack.c.bf16 %v2152_v34, %v2149_v33  ;;  %v1715_v43 = vld [vmem:[#allocation8 + $0xf0] sm:$0xff]   ;;  %v1717_v46 = vld [vmem:[#allocation8 + $0x68] sm:$0xff]   ;;  %p2381_p6 = scmp.ne.s32.totalorder %s2373_s21, 0  ;;  %s1948_s28 = smov [#allocation10]  }
  0x75   : > { %v1710_v38 = vld [vmem:[#allocation8 + $0x38] sm:$0xff]   ;;  %v1714_v44 = vld [vmem:[#allocation8 + $0x30] sm:$0xff]   ;;  %v1719_v47 = vld [vmem:[#allocation8 + $0xe8] sm:$0xff]   ;;  %v389_v14 = vshrl.u32 %v388_v13, 7  ;;  %s1867_s30 = sshll.u32 %s1948_s28, 4  ;;  %s1868_s30 = int_to_ptr.vmem [resolvable:$false] %s1867_s30 }
  0x76   : > { %575 = vmatpush1.bf16.msra.mxu0 %v1683_v15  ;;  %648 = vmatpush1.bf16.msra.mxu1 %v1684_v16  ;;  %v1712_v39 = vld [vmem:[#allocation8 + $0xb8] sm:$0xff]   ;;  %v1716_v45 = vld [vmem:[#allocation8 + $0xb0] sm:$0xff]   ;;  %v1718_v49 = vld [vmem:[#allocation8 + $0x28] sm:$0xff]   ;;  %s1869_s9 = scalar_lea.vmem %s1868_s30, 2048  ;;  %p1870_p5 = scmp.lt.s32.totalorder %s2310_s19, %s1868_s30 }
  0x77   : > { %576 = vmatprep.subr.bf16.mxu0 %v1685_v17  ;;  %649 = vmatprep.subr.bf16.mxu1 %v1687_v18  ;;  %v2160_v42 = vld [vmem:[%s2132_s29 + $0x18] sm:$0xff]  ;;  %v1720_v50 = vld [vmem:[#allocation8 + $0xa8] sm:$0xff]   ;;  %v1721_v51 = vld [vmem:[#allocation8 + $0x60] sm:$0xff]   ;;  %v394_v15 = vsub.s32 1, %v389_v14  ;;  %v402_v16 = vsub.s32 3, %v389_v14  ;;  %v390_v17 = vsub.s32 0, %v389_v14 }
  0x78   : > { %v351_v48 = vpack.c.bf16 %v2160_v42, %v2157_v41  ;;  %v2167_v52 = vld [vmem:[%s2132_s29 + $0x20] sm:$0xff]  ;;  %v2170_v53 = vld [vmem:[%s2132_s29 + $0x28] sm:$0xff]  ;;  %v2179_v62 = vld [vmem:[%s2132_s29 + $0x30] sm:$0xff]  ;;  %v398_v18 = vsub.s32 2, %v389_v14 }
  0x79   : > { %v1723_v54 = vld [vmem:[#allocation8 + $0xe0] sm:$0xff]   ;;  %v1725_v57 = vld [vmem:[#allocation8 + $0x58] sm:$0xff]   ;;  %v352_v59 = vpack.c.bf16 %v2170_v53, %v2167_v52  ;;  %v1729_v2 = vld [vmem:[#allocation8 + $0x50] sm:$0xff]  }
  0x7a   : > { %577 = vmatpush1.bf16.msra.mxu0 %v1689_v19  ;;  %650 = vmatpush1.bf16.msra.mxu1 %v1690_v20  ;;  %v1722_v55 = vld [vmem:[#allocation8 + $0x20] sm:$0xff]   ;;  %v1727_v58 = vld [vmem:[#allocation8 + $0xd8] sm:$0xff]   ;;  %v1731_v3 = vld [vmem:[#allocation8 + $0xd0] sm:$0xff]  }
  0x7b   : > { %578 = vmatprep.subr.bf16.mxu0 %v1691_v21  ;;  %651 = vmatprep.subr.bf16.mxu1 %v1693_v22  ;;  %v1724_v56 = vld [vmem:[#allocation8 + $0xa0] sm:$0xff]   ;;  %v1726_v60 = vld [vmem:[#allocation8 + $0x18] sm:$0xff]   ;;  %v1730_v4 = vld [vmem:[#allocation8 + $0x10] sm:$0xff]  }
  0x7c   : > { %v1728_v61 = vld [vmem:[#allocation8 + $0x98] sm:$0xff]   ;;  %v1732_v5 = vld [vmem:[#allocation8 + $0x90] sm:$0xff]   ;;  %v1735_v6 = vld [vmem:[#allocation8 + $0xc8] sm:$0xff]  }
  0x7d   : > { %v2182_v63 = vld [vmem:[%s2132_s29 + $0x38] sm:$0xff]  ;;  %v1734_v7 = vld [vmem:[#allocation8 + $0x8] sm:$0xff]   ;;  %v1737_v9 = vld [vmem:[#allocation8 + $0x40] sm:$0xff]   ;;  %s1863_s29 = scalar_lea.vmem %s2310_s19, 1024 }
  0x7e   : > { %579 = vmatpush1.bf16.msra.mxu0 %v1695_v23  ;;  %652 = vmatpush1.bf16.msra.mxu1 %v1696_v24  ;;  %v353_v1 = vpack.c.bf16 %v2182_v63, %v2179_v62  ;;  %v1736_v8 = vld [vmem:[#allocation8 + $0x88] sm:$0xff]   ;;  %v1739_v10 = vld [vmem:[#allocation8 + $0xc0] sm:$0xff]   ;;  %v386_v19 = vld [vmem:[#allocation7] sm:$0xf]  ;;  %p1864_p4 = scmp.ne.s32.totalorder %s2310_s19, %s1863_s29  ;;  %p1871_p3 = scmp.lt.s32.totalorder %s1869_s9, %s1863_s29 }
  0x7f   : > { %580 = vmatprep.subr.bf16.mxu0 %v1697_v25  ;;  %653 = vmatprep.subr.bf16.mxu1 %v1699_v26  ;;  %v1738_v11 = vld [vmem:[#allocation8] sm:$0xff]   ;;  %v2186_v22 = vrot.slane %v386_v19, %v394_v15  ;;  %v2188_v23 = vrot.slane %v386_v19, %v402_v16  ;;  %v2190_v24 = vrot.slane %v386_v19, %v390_v17 }
  0x80   : > { %v1740_v12 = vld [vmem:[#allocation8 + $0x80] sm:$0xff]   ;;  %v2192_v25 = vrot.slane %v386_v19, %v398_v18  ;;  %p1865_p12 = pnand %p1864_p4, %p2381_p6  ;;  %p1872_p7 = por %p1871_p3, %p1870_p5 }
  0x82   : > { %581 = vmatpush1.bf16.msra.mxu0 %v1701_v27  ;;  %654 = vmatpush1.bf16.msra.mxu1 %v1702_v28  ;;  %p1866_p0 = pneg %p1865_p12 }
  0x83   : > { %582 = vmatprep.subr.bf16.mxu0 %v1703_v29  ;;  %655 = vmatprep.subr.bf16.mxu1 %v1705_v30 }
  0x84   : > { %p1873_p9 = pnand %p1872_p7, %p1866_p0 }
  0x86   : > { %583 = vmatpush1.bf16.msra.mxu0 %v1707_v31  ;;  %656 = vmatpush1.bf16.msra.mxu1 %v1708_v32 }
  0x87   : > { %1495 = vmatprep.subr.bf16.mxu0 %v1709_v35  ;;  %1535 = vmatprep.subr.bf16.mxu1 %v1711_v36 }
  0x89   : > { %601 = vmatmul.mubr.bf16.vlgmr.msra.gmra.mxu0 %v350_v37  ;;  %674 = vmatmul.mubr.bf16.vlgmr.msra.gmra.mxu1 %v350_v37 }
  0x8a   : > { %610 = vmatprep.mubr.bf16.mxu0 %v1947_v0  ;;  %683 = vmatprep.mubr.bf16.mxu1 %v1947_v0 }
  0x8b   : > { %1496 = vmatpush3.bf16.msra.mxu0 %v1710_v38  ;;  %1536 = vmatpush3.bf16.msra.mxu1 %v1712_v39 }
  0x8c   : > { %1497 = vmatprep.subr.bf16.mxu0 %v1713_v40  ;;  %1537 = vmatprep.subr.bf16.mxu1 %v1715_v43 }
  0x8f   : > { %1498 = vmatpush3.bf16.msra.mxu0 %v1714_v44  ;;  %1538 = vmatpush3.bf16.msra.mxu1 %v1716_v45 }
  0x90   : > { %1499 = vmatprep.subr.bf16.mxu0 %v1717_v46  ;;  %1539 = vmatprep.subr.bf16.mxu1 %v1719_v47 }
  0x91   : > { %611 = vmatmul.mubr.bf16.gmra.mxu0 %v351_v48  ;;  %684 = vmatmul.mubr.bf16.gmra.mxu1 %v351_v48 }
  0x92   : > { %620 = vmatprep.mubr.bf16.mxu0 %v1947_v0  ;;  %693 = vmatprep.mubr.bf16.mxu1 %v1947_v0 }
  0x93   : > { %1500 = vmatpush3.bf16.msra.mxu0 %v1718_v49  ;;  %1540 = vmatpush3.bf16.msra.mxu1 %v1720_v50 }
  0x94   : > { %1501 = vmatprep.subr.bf16.mxu0 %v1721_v51  ;;  %1541 = vmatprep.subr.bf16.mxu1 %v1723_v54 }
  0x97   : > { %1502 = vmatpush3.bf16.msra.mxu0 %v1722_v55  ;;  %1542 = vmatpush3.bf16.msra.mxu1 %v1724_v56 }
  0x98   : > { %1503 = vmatprep.subr.bf16.mxu0 %v1725_v57  ;;  %1543 = vmatprep.subr.bf16.mxu1 %v1727_v58 }
  0x99   : > { %621 = vmatmul.mubr.bf16.gmra.mxu0 %v352_v59  ;;  %694 = vmatmul.mubr.bf16.gmra.mxu1 %v352_v59 }
  0x9a   : > { %630 = vmatprep.mubr.bf16.mxu0 %v1947_v0  ;;  %703 = vmatprep.mubr.bf16.mxu1 %v1947_v0  ;;  %v1733_v0 = vld [vmem:[#allocation8 + $0x48] sm:$0xff]  }
  0x9b   : > { %1504 = vmatpush3.bf16.msra.mxu0 %v1726_v60  ;;  %1544 = vmatpush3.bf16.msra.mxu1 %v1728_v61 }
  0x9c   : > { %1505 = vmatprep.subr.bf16.mxu0 %v1729_v2  ;;  %1545 = vmatprep.subr.bf16.mxu1 %v1731_v3 }
  0x9f   : > { %1506 = vmatpush3.bf16.msra.mxu0 %v1730_v4  ;;  %1546 = vmatpush3.bf16.msra.mxu1 %v1732_v5 }
  0xa0   : > { %1507 = vmatprep.subr.bf16.mxu0 %v1733_v0  ;;  %1547 = vmatprep.subr.bf16.mxu1 %v1735_v6 }
  0xa1   : > { %631 = vmatmul.mubr.bf16.gmra.mxu0 %v353_v1  ;;  %704 = vmatmul.mubr.bf16.gmra.mxu1 %v353_v1 }
  0xa3   : > { %1508 = vmatpush3.bf16.msra.mxu0 %v1734_v7  ;;  %1548 = vmatpush3.bf16.msra.mxu1 %v1736_v8 }
  0xa4   : > { %1509 = vmatprep.subr.bf16.mxu0 %v1737_v9  ;;  %1549 = vmatprep.subr.bf16.mxu1 %v1739_v10 }
  0xa7   : > { %1510 = vmatpush3.bf16.msra.mxu0 %v1738_v11  ;;  %1550 = vmatpush3.bf16.msra.mxu1 %v1740_v12 }
 0x149   : > { %v602_v20 = vpop.f32.mrf.mxu0  ;;  %v675_v21 = vpop.f32.mrf.mxu1 }
 0x14a   : > { %v603_v36 = vadd.f32 %v602_v20, %v2190_v24  ;;  %v676_v37 = vadd.f32 %v675_v21, %v2192_v25 }
 0x14b   : > { %v604_v26 = vpop.f32.mrf.mxu0  ;;  %v677_v27 = vpop.f32.mrf.mxu1 }
 0x14c   : > { %v605_v30 = vadd.f32 %v604_v26, %v2186_v22  ;;  %v678_v31 = vadd.f32 %v677_v27, %v2188_v23  ;;  %v714_v54 = vmax.f32 %v603_v36, 0.0  ;;  %v716_v55 = vmax.f32 %v676_v37, 0.0 }
 0x14d   : > { %v606_v28 = vpop.f32.mrf.mxu0  ;;  %v679_v29 = vpop.f32.mrf.mxu1 }
 0x14e   : > { %v607_v32 = vadd.f32 %v606_v28, %v2190_v24  ;;  %v680_v35 = vadd.f32 %v679_v29, %v2192_v25  ;;  %v715_v48 = vmax.f32 %v605_v30, 0.0  ;;  %v717_v49 = vmax.f32 %v678_v31, 0.0 }
 0x14f   : > { %v608_v38 = vpop.f32.mrf.mxu0  ;;  %v681_v39 = vpop.f32.mrf.mxu1 }
 0x150   : > { %v609_v40 = vadd.f32 %v608_v38, %v2186_v22  ;;  %v682_v43 = vadd.f32 %v681_v39, %v2188_v23  ;;  %v718_v44 = vmax.f32 %v607_v32, 0.0  ;;  %v720_v45 = vmax.f32 %v680_v35, 0.0 }
 0x151   : > { %v612_v46 = vpop.f32.mrf.mxu0  ;;  %v685_v47 = vpop.f32.mrf.mxu1 }
 0x152   : > { %v719_v50 = vmax.f32 %v609_v40, 0.0  ;;  %v721_v51 = vmax.f32 %v682_v43, 0.0  ;;  %v746_v60 = vpack.c.bf16 %v718_v44, %v714_v54  ;;  %v748_v61 = vpack.c.bf16 %v720_v45, %v716_v55 }
 0x153   : > { %v614_v56 = vpop.f32.mrf.mxu0  ;;  %v687_v57 = vpop.f32.mrf.mxu1  ;;  %v613_v6 = vadd.f32 %v612_v46, %v2190_v24  ;;  %v686_v7 = vadd.f32 %v685_v47, %v2192_v25 }
 0x154   : > { %v747_v58 = vpack.c.bf16 %v719_v50, %v715_v48  ;;  %v749_v59 = vpack.c.bf16 %v721_v51, %v717_v49  ;;  %v615_v1 = vadd.f32 %v614_v56, %v2186_v22  ;;  %v688_v4 = vadd.f32 %v687_v57, %v2188_v23 }
 0x155   : > { %v616_v2 = vpop.f32.mrf.mxu0  ;;  %v689_v3 = vpop.f32.mrf.mxu1  ;;  %v722_v20 = vmax.f32 %v613_v6, 0.0  ;;  %v724_v21 = vmax.f32 %v686_v7, 0.0 }
 0x156   : > { %v617_v5 = vadd.f32 %v616_v2, %v2190_v24  ;;  %v690_v0 = vadd.f32 %v689_v3, %v2192_v25  ;;  %1057 = vmatprep.mubr.bf16.mxu0 %v747_v58  ;;  %1122 = vmatprep.mubr.bf16.mxu1 %v749_v59  ;;  %v723_v16 = vmax.f32 %v615_v1, 0.0  ;;  %v725_v17 = vmax.f32 %v688_v4, 0.0 }
 0x157   : > { %v618_v8 = vpop.f32.mrf.mxu0  ;;  %v691_v9 = vpop.f32.mrf.mxu1  ;;  %1058 = vmatmul.mubr.bf16.vlgmr.msra.gmra.mxu0 %v746_v60  ;;  %1123 = vmatmul.mubr.bf16.vlgmr.msra.gmra.mxu1 %v748_v61 }
 0x158   : > { %v619_v10 = vadd.f32 %v618_v8, %v2186_v22  ;;  %v692_v11 = vadd.f32 %v691_v9, %v2188_v23  ;;  %v726_v12 = vmax.f32 %v617_v5, 0.0  ;;  %v728_v13 = vmax.f32 %v690_v0, 0.0 }
 0x159   : > { %v622_v14 = vpop.f32.mrf.mxu0  ;;  %v695_v15 = vpop.f32.mrf.mxu1 }
 0x15a   : > { %v727_v18 = vmax.f32 %v619_v10, 0.0  ;;  %v729_v19 = vmax.f32 %v692_v11, 0.0  ;;  %v750_v30 = vpack.c.bf16 %v726_v12, %v722_v20  ;;  %v752_v31 = vpack.c.bf16 %v728_v13, %v724_v21 }
 0x15b   : > { %v624_v26 = vpop.f32.mrf.mxu0  ;;  %v697_v27 = vpop.f32.mrf.mxu1  ;;  %v623_v40 = vadd.f32 %v622_v14, %v2190_v24  ;;  %v696_v43 = vadd.f32 %v695_v15, %v2192_v25 }
 0x15c   : > { %v751_v28 = vpack.c.bf16 %v727_v18, %v723_v16  ;;  %v753_v29 = vpack.c.bf16 %v729_v19, %v725_v17  ;;  %v625_v32 = vadd.f32 %v624_v26, %v2186_v22  ;;  %v698_v37 = vadd.f32 %v697_v27, %v2188_v23 }
 0x15d   : > { %v626_v35 = vpop.f32.mrf.mxu0  ;;  %v699_v36 = vpop.f32.mrf.mxu1  ;;  %v730_v58 = vmax.f32 %v623_v40, 0.0  ;;  %v732_v59 = vmax.f32 %v696_v43, 0.0 }
 0x15e   : > { %v627_v38 = vadd.f32 %v626_v35, %v2190_v24  ;;  %v700_v39 = vadd.f32 %v699_v36, %v2192_v25  ;;  %1065 = vmatprep.mubr.bf16.mxu0 %v751_v28  ;;  %1130 = vmatprep.mubr.bf16.mxu1 %v753_v29  ;;  %v731_v54 = vmax.f32 %v625_v32, 0.0  ;;  %v733_v55 = vmax.f32 %v698_v37, 0.0 }
 0x15f   : > { %v628_v44 = vpop.f32.mrf.mxu0  ;;  %v701_v45 = vpop.f32.mrf.mxu1  ;;  %1066 = vmatmul.mubr.bf16.gmra.mxu0 %v750_v30  ;;  %1131 = vmatmul.mubr.bf16.gmra.mxu1 %v752_v31 }
 0x160   : > { %v629_v46 = vadd.f32 %v628_v44, %v2186_v22  ;;  %v702_v47 = vadd.f32 %v701_v45, %v2188_v23  ;;  %v734_v48 = vmax.f32 %v627_v38, 0.0  ;;  %v736_v49 = vmax.f32 %v700_v39, 0.0 }
 0x161   : > { %v632_v50 = vpop.f32.mrf.mxu0  ;;  %v705_v51 = vpop.f32.mrf.mxu1 }
 0x162   : > { %v735_v56 = vmax.f32 %v629_v46, 0.0  ;;  %v737_v57 = vmax.f32 %v702_v47, 0.0  ;;  %v754_v3 = vpack.c.bf16 %v734_v48, %v730_v58  ;;  %v756_v4 = vpack.c.bf16 %v736_v49, %v732_v59 }
 0x163   : > { %v634_v60 = vpop.f32.mrf.mxu0  ;;  %v707_v61 = vpop.f32.mrf.mxu1  ;;  %v633_v10 = vadd.f32 %v632_v50, %v2190_v24  ;;  %v706_v11 = vadd.f32 %v705_v51, %v2192_v25 }
 0x164   : > { %v755_v1 = vpack.c.bf16 %v735_v56, %v731_v54  ;;  %v757_v2 = vpack.c.bf16 %v737_v57, %v733_v55  ;;  %v635_v5 = vadd.f32 %v634_v60, %v2186_v22  ;;  %v708_v7 = vadd.f32 %v707_v61, %v2188_v23 }
 0x165   : > { %v636_v0 = vpop.f32.mrf.mxu0  ;;  %v709_v6 = vpop.f32.mrf.mxu1  ;;  %v738_v26 = vmax.f32 %v633_v10, 0.0  ;;  %v740_v27 = vmax.f32 %v706_v11, 0.0 }
 0x166   : > { %v637_v8 = vadd.f32 %v636_v0, %v2190_v24  ;;  %v710_v9 = vadd.f32 %v709_v6, %v2192_v25  ;;  %1073 = vmatprep.mubr.bf16.mxu0 %v755_v1  ;;  %1138 = vmatprep.mubr.bf16.mxu1 %v757_v2  ;;  %v739_v18 = vmax.f32 %v635_v5, 0.0  ;;  %v741_v19 = vmax.f32 %v708_v7, 0.0 }
 0x167   : > { %v638_v12 = vpop.f32.mrf.mxu0  ;;  %v711_v13 = vpop.f32.mrf.mxu1  ;;  %1074 = vmatmul.mubr.bf16.gmra.mxu0 %v754_v3  ;;  %1139 = vmatmul.mubr.bf16.gmra.mxu1 %v756_v4 }
 0x168   : > { %v639_v14 = vadd.f32 %v638_v12, %v2186_v22  ;;  %v712_v15 = vadd.f32 %v711_v13, %v2188_v23  ;;  %v742_v16 = vmax.f32 %v637_v8, 0.0  ;;  %v744_v17 = vmax.f32 %v710_v9, 0.0  ;;  %v2229_v23 = vld [vmem:[%s2358_s4] ss:$0 sm:$0xff] }
 0x16a   : > { %v743_v20 = vmax.f32 %v639_v14, 0.0  ;;  %v745_v21 = vmax.f32 %v712_v15, 0.0  ;;  %v758_v29 = vpack.c.bf16 %v742_v16, %v738_v26  ;;  %v760_v25 = vpack.c.bf16 %v744_v17, %v740_v27 }
 0x16c   : > { %v759_v28 = vpack.c.bf16 %v743_v20, %v739_v18  ;;  %v761_v24 = vpack.c.bf16 %v745_v21, %v741_v19 }
 0x16e   : > { %1081 = vmatprep.mubr.bf16.mxu0 %v759_v28  ;;  %1146 = vmatprep.mubr.bf16.mxu1 %v761_v24 }
 0x16f   : > { %1082 = vmatmul.mubr.bf16.gmra.mxu0 %v758_v29  ;;  %1147 = vmatmul.mubr.bf16.gmra.mxu1 %v760_v25 }
 0x217   : > { %v1511_v30 = vpop.f32.mrf.mxu0  ;;  %v1551_v22 = vpop.f32.mrf.mxu1 }
 0x219   : > { %v1512_v31 = vpop.f32.mrf.mxu0  ;;  %v1552_v32 = vpop.f32.mrf.mxu1 }
 0x21a   : > { %v1513_v35 = vadd.f32 %v1512_v31, %v1511_v30  ;;  %v1553_v39 = vadd.f32 %v1552_v32, %v1551_v22 }
 0x21b   : > { %v1514_v36 = vpop.f32.mrf.mxu0  ;;  %v1554_v37 = vpop.f32.mrf.mxu1 }
 0x21c   : > { %v1060_v38 = vadd.f32 %v1513_v35, %v2229_v23 }
 0x21d   : > { %v1515_v40 = vpop.f32.mrf.mxu0  ;;  %v1555_v43 = vpop.f32.mrf.mxu1 }
 0x21e   : > { %v1125_v44 = vadd.f32 %v1553_v39, %v1060_v38  ;;  %v1516_v45 = vadd.f32 %v1515_v40, %v1514_v36  ;;  %v1556_v49 = vadd.f32 %v1555_v43, %v1554_v37 }
 0x21f   : > { %v1517_v46 = vpop.f32.mrf.mxu0  ;;  %v1557_v47 = vpop.f32.mrf.mxu1 }
 0x220   : > { %v1063_v48 = vadd.f32 %v1516_v45, %v2229_v23  ;;  %v2234_v50 = vadd.f32 %v1125_v44, %v2149_v33 }
 0x221   : > { %v1518_v51 = vpop.f32.mrf.mxu0  ;;  %v1558_v54 = vpop.f32.mrf.mxu1 }
 0x222   : > { %v1128_v55 = vadd.f32 %v1556_v49, %v1063_v48  ;;  %v1519_v56 = vadd.f32 %v1518_v51, %v1517_v46  ;;  %1163 = vadd.xlane.f32.xlu0 %v2234_v50  ;;  %v1559_v60 = vadd.f32 %v1558_v54, %v1557_v47 }
 0x223   : > { %v1520_v57 = vpop.f32.mrf.mxu0  ;;  %v1560_v58 = vpop.f32.mrf.mxu1 }
 0x224   : > { %v1068_v59 = vadd.f32 %v1519_v56, %v2229_v23  ;;  %v1156_v61 = vadd.f32 %v1128_v55, %v2152_v34 }
 0x225   : > { %v1521_v1 = vpop.f32.mrf.mxu0  ;;  %v1561_v2 = vpop.f32.mrf.mxu1 }
 0x226   : > { %v1133_v3 = vadd.f32 %v1559_v60, %v1068_v59  ;;  %v1522_v4 = vadd.f32 %v1521_v1, %v1520_v57  ;;  %1165 = vadd.xlane.f32.xlu0 %v1156_v61  ;;  %v1562_v6 = vadd.f32 %v1561_v2, %v1560_v58 }
 0x227   : > { %v1523_v33 = vpop.f32.mrf.mxu0  ;;  %v1563_v5 = vpop.f32.mrf.mxu1 }
 0x228   : > { %v1071_v0 = vadd.f32 %v1522_v4, %v2229_v23  ;;  %v1157_v7 = vadd.f32 %v1133_v3, %v2157_v41 }
 0x229   : > { %v1524_v8 = vpop.f32.mrf.mxu0  ;;  %v1564_v9 = vpop.f32.mrf.mxu1 }
 0x22a   : > { %v1136_v10 = vadd.f32 %v1562_v6, %v1071_v0  ;;  %v1525_v11 = vadd.f32 %v1524_v8, %v1523_v33  ;;  %1167 = vadd.xlane.f32.xlu1 %v1157_v7  ;;  %v1565_v14 = vadd.f32 %v1564_v9, %v1563_v5 }
 0x22b   : > { %v1526_v12 = vpop.f32.mrf.mxu0  ;;  %v1566_v13 = vpop.f32.mrf.mxu1 }
 0x22c   : > { %v1076_v34 = vadd.f32 %v1525_v11, %v2229_v23  ;;  %v1158_v15 = vadd.f32 %v1136_v10, %v2160_v42 }
 0x22d   : > { %v1527_v16 = vpop.f32.mrf.mxu0  ;;  %v1567_v17 = vpop.f32.mrf.mxu1 }
 0x22e   : > { %v1141_v18 = vadd.f32 %v1565_v14, %v1076_v34  ;;  %v1528_v19 = vadd.f32 %v1527_v16, %v1526_v12  ;;  %1169 = vadd.xlane.f32.xlu1 %v1158_v15  ;;  %v1568_v26 = vadd.f32 %v1567_v17, %v1566_v13 }
 0x22f   : > { %v1529_v20 = vpop.f32.mrf.mxu0  ;;  %v1569_v21 = vpop.f32.mrf.mxu1 }
 0x230   : > { %v1079_v41 = vadd.f32 %v1528_v19, %v2229_v23  ;;  %v1159_v27 = vadd.f32 %v1141_v18, %v2167_v52 }
 0x231   : > { %v1530_v28 = vpop.f32.mrf.mxu0  ;;  %v1570_v24 = vpop.f32.mrf.mxu1 }
 0x232   : > { %v1144_v29 = vadd.f32 %v1568_v26, %v1079_v41  ;;  %v1531_v25 = vadd.f32 %v1530_v28, %v1529_v20  ;;  %1171 = vadd.xlane.f32.xlu0 %v1159_v27  ;;  %v1571_v31 = vadd.f32 %v1570_v24, %v1569_v21  ;;  %v1486_v24 = vld [vmem:[%s2359_s5] ss:$0 sm:$0xff] }
 0x233   : > { %v1532_v30 = vpop.f32.mrf.mxu0  ;;  %v1572_v22 = vpop.f32.mrf.mxu1 }
 0x234   : > { %v1084_v42 = vadd.f32 %v1531_v25, %v2229_v23  ;;  %v1160_v32 = vadd.f32 %v1144_v29, %v2170_v53 }
 0x235   : > { %v1533_v35 = vpop.f32.mrf.mxu0  ;;  %v1573_v36 = vpop.f32.mrf.mxu1 }
 0x236   : > { %v1149_v37 = vadd.f32 %v1571_v31, %v1084_v42  ;;  %v1534_v38 = vadd.f32 %v1533_v35, %v1532_v30  ;;  %1173 = vadd.xlane.f32.xlu1 %v1160_v32  ;;  %v1574_v52 = vadd.f32 %v1573_v36, %v1572_v22  ;;  %v1487_v30 = vld [vmem:[%s2360_s6] ss:$0 sm:$0xff] }
 0x238   : > { %v1087_v39 = vadd.f32 %v1534_v38, %v2229_v23  ;;  %v1161_v40 = vadd.f32 %v1149_v37, %v2179_v62 }
 0x23a   : > { %v1152_v43 = vadd.f32 %v1574_v52, %v1087_v39  ;;  %1175 = vadd.xlane.f32.xlu0 %v1161_v40 }
 0x23c   : > { %v1162_v44 = vadd.f32 %v1152_v43, %v2182_v63 }
 0x23e   : > { %1177 = vadd.xlane.f32.xlu1 %v1162_v44 }
 0x2ab   : > { %v1164_v45 = vpop.xlane.xlu0 %1163 }
 0x2ac   : > { %v1180_v46 = vmul.f32 0.0078125, %v1164_v45 }
 0x2ae   : > { %v1188_v47 = vsub.f32 %v2234_v50, %v1180_v46 }
 0x2af   : > { %v1166_v53 = vpop.xlane.xlu0 %1165 }
 0x2b0   : > { %v1181_v48 = vmul.f32 0.0078125, %v1166_v53  ;;  %v1196_v49 = vmul.f32 %v1188_v47, %v1188_v47 }
 0x2b2   : > { %v2251_v51 = vsub.f32 %v1156_v61, %v1181_v48  ;;  %1204 = vadd.xlane.f32.xlu0 %v1196_v49 }
 0x2b3   : > { %v1168_v54 = vpop.xlane.xlu1 %1167 }
 0x2b4   : > { %v1182_v23 = vmul.f32 0.0078125, %v1168_v54  ;;  %v1197_v62 = vmul.f32 %v2251_v51, %v2251_v51 }
 0x2b6   : > { %v2255_v55 = vsub.f32 %v1157_v7, %v1182_v23  ;;  %1206 = vadd.xlane.f32.xlu1 %v1197_v62 }
 0x2b7   : > { %v1170_v63 = vpop.xlane.xlu1 %1169 }
 0x2b8   : > { %v1183_v56 = vmul.f32 0.0078125, %v1170_v63  ;;  %v1198_v57 = vmul.f32 %v2255_v55, %v2255_v55 }
 0x2ba   : > { %v2259_v50 = vsub.f32 %v1158_v15, %v1183_v56  ;;  %1208 = vadd.xlane.f32.xlu0 %v1198_v57 }
 0x2bb   : > { %v1172_v58 = vpop.xlane.xlu0 %1171 }
 0x2bc   : > { %v1184_v59 = vmul.f32 0.0078125, %v1172_v58  ;;  %v1199_v60 = vmul.f32 %v2259_v50, %v2259_v50 }
 0x2be   : > { %v2263_v61 = vsub.f32 %v1159_v27, %v1184_v59  ;;  %1210 = vadd.xlane.f32.xlu1 %v1199_v60 }
 0x2bf   : > { %v1174_v1 = vpop.xlane.xlu1 %1173 }
 0x2c0   : > { %v1185_v2 = vmul.f32 0.0078125, %v1174_v1  ;;  %v1200_v3 = vmul.f32 %v2263_v61, %v2263_v61 }
 0x2c2   : > { %v2267_v4 = vsub.f32 %v1160_v32, %v1185_v2  ;;  %1212 = vadd.xlane.f32.xlu0 %v1200_v3 }
 0x2c3   : > { %v1176_v33 = vpop.xlane.xlu0 %1175 }
 0x2c4   : > { %v1186_v5 = vmul.f32 0.0078125, %v1176_v33  ;;  %v1201_v0 = vmul.f32 %v2267_v4, %v2267_v4 }
 0x2c6   : > { %v2271_v6 = vsub.f32 %v1161_v40, %v1186_v5  ;;  %1214 = vadd.xlane.f32.xlu1 %v1201_v0 }
 0x2c7   : > { %v1178_v7 = vpop.xlane.xlu1 %1177 }
 0x2c8   : > { %v1187_v8 = vmul.f32 0.0078125, %v1178_v7  ;;  %v1202_v9 = vmul.f32 %v2271_v6, %v2271_v6 }
 0x2ca   : > { %v2275_v10 = vsub.f32 %v1162_v44, %v1187_v8  ;;  %1216 = vadd.xlane.f32.xlu0 %v1202_v9 }
 0x2cc   : > { %v1203_v11 = vmul.f32 %v2275_v10, %v2275_v10 }
 0x2ce   : > { %1218 = vadd.xlane.f32.xlu1 %v1203_v11 }
 0x33b   : > { %v1205_v12 = vpop.xlane.xlu0 %1204 }
 0x33c   : > { %v1220_v13 = vmul.f32 0.0078125, %v1205_v12 }
 0x33e   : > { %v1228_v34 = vadd.f32 1e-05, %v1220_v13 }
 0x33f   : > { %v1207_v14 = vpop.xlane.xlu1 %1206 }
 0x340   : > { %1741 = vrsqrt.f32 %v1228_v34  ;;  %v1221_v15 = vmul.f32 0.0078125, %v1207_v14 }
 0x342   : > { %v1229_v16 = vadd.f32 1e-05, %v1221_v15 }
 0x343   : > { %v1209_v17 = vpop.xlane.xlu0 %1208 }
 0x344   : > { %1743 = vrsqrt.f32 %v1229_v16  ;;  %v1222_v18 = vmul.f32 0.0078125, %v1209_v17 }
 0x346   : > { %v1230_v19 = vadd.f32 1e-05, %v1222_v18 }
 0x347   : > { %v1211_v20 = vpop.xlane.xlu1 %1210 }
 0x348   : > { %1745 = vrsqrt.f32 %v1230_v19  ;;  %v1223_v21 = vmul.f32 0.0078125, %v1211_v20 }
 0x34a   : > { %v1231_v41 = vadd.f32 1e-05, %v1223_v21 }
 0x34b   : > { %v1213_v26 = vpop.xlane.xlu0 %1212 }
 0x34c   : > { %1747 = vrsqrt.f32 %v1231_v41  ;;  %v1224_v27 = vmul.f32 0.0078125, %v1213_v26 }
 0x34d   : > { %v1742_v28 = vpop.eup %1741 }
 0x34e   : > { %v1244_v29 = vmul.f32 %v1742_v28, %v1188_v47  ;;  %v1232_v25 = vadd.f32 1e-05, %v1224_v27 }
 0x34f   : > { %v1215_v22 = vpop.xlane.xlu1 %1214 }
 0x350   : > { %v1259_v42 = vmul.f32 %v1486_v24, %v1244_v29  ;;  %1749 = vrsqrt.f32 %v1232_v25  ;;  %v1225_v31 = vmul.f32 0.0078125, %v1215_v22 }
 0x351   : > { %v1744_v32 = vpop.eup %1743 }
 0x352   : > { %v1274_v35 = vadd.f32 %v1487_v30, %v1259_v42  ;;  %v1245_v36 = vmul.f32 %v1744_v32, %v2251_v51  ;;  %v1233_v37 = vadd.f32 1e-05, %v1225_v31 }
 0x353   : > { %v1217_v38 = vpop.xlane.xlu0 %1216 }
 0x354   : > { %1282 = vst [vmem:[%s2288_s12] sm:$0xff] %v1274_v35  ;;  %v1260_v39 = vmul.f32 %v1486_v24, %v1245_v36  ;;  %1751 = vrsqrt.f32 %v1233_v37  ;;  %v1226_v52 = vmul.f32 0.0078125, %v1217_v38 }
 0x355   : > { %v1746_v40 = vpop.eup %1745 }
 0x356   : > { %v1275_v43 = vadd.f32 %v1487_v30, %v1260_v39  ;;  %v1246_v44 = vmul.f32 %v1746_v40, %v2255_v55  ;;  %v1234_v45 = vadd.f32 1e-05, %v1226_v52 }
 0x357   : > { %v1219_v46 = vpop.xlane.xlu1 %1218 }
 0x358   : > { %1283 = vst [vmem:[%s2288_s12 + $0x8] sm:$0xff] %v1275_v43  ;;  %v1261_v47 = vmul.f32 %v1486_v24, %v1246_v44  ;;  %1753 = vrsqrt.f32 %v1234_v45  ;;  %v1227_v53 = vmul.f32 0.0078125, %v1219_v46 }
 0x359   : > { %v1748_v48 = vpop.eup %1747 }
 0x35a   : > { %v1276_v49 = vadd.f32 %v1487_v30, %v1261_v47  ;;  %v1247_v51 = vmul.f32 %v1748_v48, %v2259_v50  ;;  %v1235_v54 = vadd.f32 1e-05, %v1227_v53 }
 0x35c   : > { %1284 = vst [vmem:[%s2288_s12 + $0x10] sm:$0xff] %v1276_v49  ;;  %v1262_v23 = vmul.f32 %v1486_v24, %v1247_v51  ;;  %1755 = vrsqrt.f32 %v1235_v54 }
 0x35d   : > { %v1750_v62 = vpop.eup %1749 }
 0x35e   : > { %v1277_v63 = vadd.f32 %v1487_v30, %v1262_v23  ;;  %v1248_v55 = vmul.f32 %v1750_v62, %v2263_v61 }
 0x360   : > { %1285 = vst [vmem:[%s2288_s12 + $0x18] sm:$0xff] %v1277_v63  ;;  %v1263_v56 = vmul.f32 %v1486_v24, %v1248_v55 }
 0x361   : > { %v1752_v57 = vpop.eup %1751 }
 0x362   : > { %v1278_v58 = vadd.f32 %v1487_v30, %v1263_v56  ;;  %v1249_v59 = vmul.f32 %v1752_v57, %v2267_v4 }
 0x364   : > { %1286 = vst [vmem:[%s2288_s12 + $0x20] sm:$0xff] %v1278_v58  ;;  %v1264_v50 = vmul.f32 %v1486_v24, %v1249_v59 }
 0x365   : > { %v1754_v60 = vpop.eup %1753 }
 0x366   : > { %v1279_v1 = vadd.f32 %v1487_v30, %v1264_v50  ;;  %v1250_v2 = vmul.f32 %v1754_v60, %v2271_v6 }
 0x368   : > { %1287 = vst [vmem:[%s2288_s12 + $0x28] sm:$0xff] %v1279_v1  ;;  %v1265_v61 = vmul.f32 %v1486_v24, %v1250_v2 }
 0x369   : > { %v1756_v3 = vpop.eup %1755 }
 0x36a   : > { %v1280_v33 = vadd.f32 %v1487_v30, %v1265_v61  ;;  %v1251_v5 = vmul.f32 %v1756_v3, %v2275_v10 }
 0x36c   : > { %1288 = vst [vmem:[%s2288_s12 + $0x30] sm:$0xff] %v1280_v33  ;;  %v1266_v0 = vmul.f32 %v1486_v24, %v1251_v5 }
 0x36e   : > { %v1281_v4 = vadd.f32 %v1487_v30, %v1266_v0 }
 0x370   : > { %1289 = vst [vmem:[%s2288_s12 + $0x38] sm:$0xff] %v1281_v4 }
 0x371   : > { %1876 = shalt.err (!%p1873_p9)
}
 0x372   : > { %s1877_s10 = scalar_lea.hbm %s2308_s1, 1024  ;;  %s1881_s15 = scalar_lea.hbm %s2361_s7, 2048 }
 0x373   : > { %p1878_p1 = scmp.ne.s32.totalorder %s2308_s1, %s1877_s10  ;;  %p1882_p11 = scmp.lt.s32.totalorder %s2308_s1, %s2361_s7 }
 0x374   : > { %p1883_p13 = scmp.lt.s32.totalorder %s1881_s15, %s1877_s10 }
 0x375   : > { %p1879_p8 = pnand %p1878_p1, %p2381_p6 }
 0x376   : > { %p1884_p2 = por %p1883_p13, %p1882_p11 }
 0x377   : > { %p1880_p10 = pneg %p1879_p8 }
 0x379   : > { %p1885_p4 = pnand %p1884_p2, %p1880_p10 }
 0x37b   : > { %1888 = shalt.err (!%p1885_p4)
}
 0x37c   : > { %s1949_s18 = smov 128   ;;  %s1950_s22 = smov 8  }
 0x37d   : > { %1589 = dma.vmem_to_hbm [thread:$0]  (%p2381_p6), %s2310_s19, 1024, %s2308_s1, %s1291_s23, %s1949_s18, %s1949_s18, %s1950_s22  }
 0x37e PF: > { %s1319_s29 = sand.u32 1, %s1923_s24   ;;  %p2382_p12 = scmp.ne.s32.totalorder %s2368_s8, 0 }
 0x37f   : > { %p2383_p0 = scmp.ge.s32.totalorder %s1935_s27, 2  ;;  %s1320_s28 = scalar_lea.sflag [#allocation4], %s1319_s29 }
 0x381   : > { %p1606_p5 = pnand %p2383_p0, %p2382_p12 }
 0x383   : > { %p1607_p3 = pneg %p1606_p5 }
 0x385   : > { %1918 = dma.done.wait (%p1607_p3), %s1320_s28, 1024  }
 0x386   : > { %1920 = vsyncadd (%p1607_p3), %s1320_s28, 4294966272  ;;  %p22_p7 = scmp.ge.s32.totalorder %s2071_s17, 4   ;;  %s2384_s24 = smov %s1927_s25 }
 0x387   : > { %s2385_s25 = smov %s1931_s26  ;;  %s2386_s26 = smov %s2081_s20 }
 0x388   : > { %s2387_s27 = smov %s2071_s17  ;;  %24 = sbr.rel (!%p22_p7) target bundleno = 9 (0x9), region = 105 }
 0x38d   :  { %1325 = vsyncpa [#allocation3], 1 }
 0x38e   :  { %1327 = vsyncpa [#allocation3 + $0x1], 1 }
 0x38f   :  { %1328 = vsyncpa [#allocation6], 1 }
 0x390   :  { %1329 = vsyncpa [#allocation9], 1 }
 0x391   :  { %1330 = vsyncpa [#allocation4], 1 }
 0x392   :  { %1332 = vsyncpa [#allocation4 + $0x1], 1 }

</bundles_post_ra>
